<compile_context>
chip_gen: v7x
topology: tpu7x:2x2x1
jax: 0.10.0
libtpu: 0.0.40
codegen_flags: <defaults>
</compile_context>

<pallas_src>
import functools
import math

import jax
import jax.numpy as jnp
from jax import lax
from jax.experimental import pallas as pl
from jax.experimental.pallas import tpu as pltpu


def _adapter_kernel(x_ref, wd_ref, wu_ref, p_ref, o_ref, *, inv_n, pad_lanes):
    """Fused adapter forward for one [TM, Hp] tile of tokens.

    x_ref : (TM, Hp) input tokens (native / matmul dtype)
    wd_ref: (Hp, A)  down-projection weight
    wu_ref: (A, Hp)  up-projection weight
    p_ref : (4, W)   f32 param slab rows = [b_down | b_up | gamma | beta]
    o_ref : (TM, Hp) output tokens
    inv_n : 1 / real hidden size (padded hidden lanes are exactly zero)
    pad_lanes: Hp - real hidden size (two-pass variance correction)
    """
    hp = x_ref.shape[1]
    a_dim = wd_ref.shape[1]

    x = x_ref[...]
    b_down = p_ref[0:1, :a_dim]
    b_up = p_ref[1:2, :hp]
    gamma = p_ref[2:3, :hp]
    beta = p_ref[3:4, :hp]

    # Down projection (MXU, f32 accumulation) + bias; exact erf GELU in f32.
    d = jnp.dot(x, wd_ref[...], preferred_element_type=jnp.float32) + b_down
    a = 0.5 * d * (1.0 + lax.erf(d * (1.0 / math.sqrt(2.0))))

    # Up projection (MXU, native-dtype operands, f32 accumulation) + bias.
    u = jnp.dot(a.astype(wu_ref.dtype), wu_ref[...],
                preferred_element_type=jnp.float32) + b_up

    # Residual + two-pass LayerNorm (eps=1e-5) over the *real* hidden dim.
    # Padded hidden lanes of x/u are exactly zero, so the sums divided by the
    # real H are correct; the pad_lanes*mean^2 term removes the padded lanes'
    # contribution to sum((y - mean)^2).
    y = u + x.astype(jnp.float32)
    mean = jnp.sum(y, axis=-1, keepdims=True) * inv_n
    c = y - mean
    ssq = jnp.sum(c * c, axis=-1, keepdims=True)
    if pad_lanes:
        ssq = ssq - float(pad_lanes) * (mean * mean)
    var = ssq * inv_n
    y_norm = c * lax.rsqrt(var + 1e-5)

    # gamma/beta are zero in padded lanes -> padded output lanes are exactly 0.
    o_ref[...] = (y_norm * gamma + beta).astype(o_ref.dtype)


def _round_up(n, m):
    return ((n + m - 1) // m) * m


def _chip_defaults():
    """(token tile, vmem_limit_bytes) per TPU generation."""
    kind = ""
    try:
        kind = jax.devices()[0].device_kind.lower()
    except Exception:
        pass
    if "v7" in kind:
        # v7x: 64 MiB physical VMEM per TensorCore, weights replicated per TC.
        return 256, 48 * 1024 * 1024
    # v5e / v6e: 128 MiB physical VMEM; bigger tile amortizes grid-step overhead.
    return 512, 96 * 1024 * 1024


def context_adapter(hidden_states, w_down, b_down, w_up, b_up, gamma, beta,
                    *, tm=None, matmul_dtype=None):
    """Fused adapter: LayerNorm(x + up(GELU(down(x)))).

    hidden_states: [B, S, H]; w_down: [H, A]; b_down: [A]; w_up: [A, H];
    b_up, gamma, beta: [H].

    tm: token tile (defaults per chip generation).  matmul_dtype: optional cast
    for the matmul operands only (e.g. jnp.bfloat16 on v5e) — changes numerics.
    """
    B, S, H = hidden_states.shape
    A = w_down.shape[1]
    M = B * S

    default_tm, vmem_limit = _chip_defaults()
    if tm is None:
        tm = default_tm

    # Round the token tile to the dtype's sublane packing (8 f32 / 16 bf16 / 32 i8).
    itemsize = jnp.dtype(hidden_states.dtype).itemsize
    packing = {4: 8, 2: 16, 1: 32}.get(itemsize, 8)
    tm = _round_up(min(tm, _round_up(M, packing)), packing)

    # Lane-pad the hidden dim only when H % 128 != 0; A is never padded.
    Hp = _round_up(H, 128) if H % 128 else H
    x2d = hidden_states.reshape(M, H)
    wd, wu = w_down, w_up
    if Hp != H:
        x2d = jnp.pad(x2d, ((0, 0), (0, Hp - H)))
        wd = jnp.pad(wd, ((0, Hp - H), (0, 0)))
        wu = jnp.pad(wu, ((0, 0), (0, Hp - H)))
    if matmul_dtype is not None:
        x2d = x2d.astype(matmul_dtype)
        wd = wd.astype(matmul_dtype)
        wu = wu.astype(matmul_dtype)

    # Fuse the four per-channel parameter vectors into one f32 slab (one DMA).
    W = max(Hp, A)
    pslab = jnp.zeros((4, W), jnp.float32)
    pslab = pslab.at[0, :A].set(b_down.astype(jnp.float32))
    pslab = pslab.at[1, :H].set(b_up.astype(jnp.float32))
    pslab = pslab.at[2, :H].set(gamma.astype(jnp.float32))
    pslab = pslab.at[3, :H].set(beta.astype(jnp.float32))

    kernel = functools.partial(_adapter_kernel, inv_n=1.0 / H, pad_lanes=Hp - H)
    grid = (pl.cdiv(M, tm),)     # ragged last block handled by Pallas masking

    w_bytes = jnp.dtype(wd.dtype).itemsize
    cost = pl.CostEstimate(
        flops=4 * M * H * A,
        transcendentals=M * (A + 1),
        bytes_accessed=(M * Hp * (jnp.dtype(x2d.dtype).itemsize
                                  + jnp.dtype(hidden_states.dtype).itemsize)
                        + 2 * Hp * A * w_bytes + 4 * W * 4),
    )

    def _run(extras):
        mode = {"pipeline_mode": pl.Buffered(1)} if extras else {}
        in_specs = [
            pl.BlockSpec((tm, Hp), lambda i: (i, 0)),           # streamed tokens
            pl.BlockSpec((Hp, A), lambda i: (0, 0), **mode),    # resident w_down
            pl.BlockSpec((A, Hp), lambda i: (0, 0), **mode),    # resident w_up
            pl.BlockSpec((4, W), lambda i: (0, 0), **mode),     # resident params
        ]
        call_kwargs = {"cost_estimate": cost} if extras else {}
        return pl.pallas_call(
            kernel,
            out_shape=jax.ShapeDtypeStruct((M, Hp), hidden_states.dtype),
            grid_spec=pltpu.PrefetchScalarGridSpec(
                num_scalar_prefetch=0,
                grid=grid,
                in_specs=in_specs,
                out_specs=pl.BlockSpec((tm, Hp), lambda i: (i, 0)),
            ),
            compiler_params=pltpu.CompilerParams(
                dimension_semantics=("parallel",),
                vmem_limit_bytes=vmem_limit,
            ),
            **call_kwargs,
        )(x2d, wd, wu, pslab)

    try:
        out2d = _run(True)
    except Exception:
        # Fall back if pl.Buffered(1)/cost_estimate is rejected by this
        # jax/Mosaic combination; the kernel body and tiling are unchanged.
        out2d = _run(False)

    if Hp != H:
        out2d = out2d[:, :H]
    return out2d.reshape(B, S, H)


def _reference_adapter(x, w_down, b_down, w_up, b_up, gamma, beta):
    """Pure-JAX reference mirroring the PyTorch module."""
    d = x @ w_down + b_down
    a = 0.5 * d * (1.0 + lax.erf(d / jnp.sqrt(2.0)))
    u = a @ w_up + b_up
    y = u + x
    mean = jnp.mean(y, axis=-1, keepdims=True)
    var = jnp.mean((y - mean) ** 2, axis=-1, keepdims=True)
    return (y - mean) / jnp.sqrt(var + 1e-5) * gamma + beta


if __name__ == "__main__":
    # Small shapes consistent with the module: batch=2, seq=8, hidden=32, adapter=8.
    B, S, H, A = 2, 8, 32, 8
    key = jax.random.PRNGKey(0)
    k_x, k_wd, k_bd, k_wu, k_bu, k_x2 = jax.random.split(key, 6)

    hidden_states = jax.random.normal(k_x, (B, S, H), dtype=jnp.float32)

    # Deterministic parameter init (mimicking nn.Linear uniform(-1/sqrt(fan_in), ...)).
    lim_d = 1.0 / math.sqrt(H)
    lim_u = 1.0 / math.sqrt(A)
    w_down = jax.random.uniform(k_wd, (H, A), jnp.float32, -lim_d, lim_d)
    b_down = jax.random.uniform(k_bd, (A,), jnp.float32, -lim_d, lim_d)
    w_up = jax.random.uniform(k_wu, (A, H), jnp.float32, -lim_u, lim_u)
    b_up = jax.random.uniform(k_bu, (H,), jnp.float32, -lim_u, lim_u)
    gamma = jnp.ones((H,), jnp.float32)    # nn.LayerNorm default weight
    beta = jnp.zeros((H,), jnp.float32)    # nn.LayerNorm default bias

    out = jax.block_until_ready(
        context_adapter(hidden_states, w_down, b_down, w_up, b_up, gamma, beta))
    ref = _reference_adapter(hidden_states, w_down, b_down, w_up, b_up, gamma, beta)
    assert out.shape == (B, S, H)
    assert jnp.allclose(out, ref, atol=1e-5, rtol=1e-5), "mismatch vs reference"

    # Ragged-M path (M % tm != 0): last-block rows are masked on the write-back.
    hs_ragged = jax.random.normal(k_x2, (B, 7, H), dtype=jnp.float32)
    out_r = jax.block_until_ready(
        context_adapter(hs_ragged, w_down, b_down, w_up, b_up, gamma, beta, tm=8))
    ref_r = _reference_adapter(hs_ragged, w_down, b_down, w_up, b_up, gamma, beta)
    assert jnp.allclose(out_r, ref_r, atol=1e-5, rtol=1e-5), "ragged-M mismatch"

    print("KERNEL_OK")
</pallas_src>

<mosaic_0001>
module attributes {stable_mosaic.version = 11 : i64} {
  func.func @_adapter_kernel(%arg0: i32, %arg1: memref<16x128xf32, #tpu.memory_space<vmem>>, %arg2: memref<128x8xf32, #tpu.memory_space<vmem>>, %arg3: memref<8x128xf32, #tpu.memory_space<vmem>>, %arg4: memref<4x128xf32, #tpu.memory_space<vmem>>, %arg5: memref<16x128xf32, #tpu.memory_space<vmem>>) attributes {dimension_semantics = [#tpu.dimension_semantics<parallel>], iteration_bounds = array<i64: 1>, scalar_prefetch = 0 : i64, scratch_operands = 0 : i64, tpu.core_type = #tpu.core_type<tc>, window_params = [{transform_indices = @transform_0, window_bounds = array<i64: 16, 128>}, {pipeline_mode = #tpu.pipeline_mode<synchronous>, transform_indices = @transform_1, window_bounds = array<i64: 128, 8>}, {pipeline_mode = #tpu.pipeline_mode<synchronous>, transform_indices = @transform_2, window_bounds = array<i64: 8, 128>}, {pipeline_mode = #tpu.pipeline_mode<synchronous>, transform_indices = @transform_3, window_bounds = array<i64: 4, 128>}, {transform_indices = @transform_4, window_bounds = array<i64: 16, 128>}]} {
    %c0 = arith.constant 0 : index
    %c0_0 = arith.constant 0 : index
    %0 = vector.load %arg1[%c0, %c0_0] : memref<16x128xf32, #tpu.memory_space<vmem>>, vector<16x128xf32>
    %c0_1 = arith.constant 0 : index
    %c0_2 = arith.constant 0 : index
    %1 = vector.load %arg4[%c0_1, %c0_2] : memref<4x128xf32, #tpu.memory_space<vmem>>, vector<1x8xf32>
    %c1 = arith.constant 1 : index
    %c0_3 = arith.constant 0 : index
    %2 = vector.load %arg4[%c1, %c0_3] : memref<4x128xf32, #tpu.memory_space<vmem>>, vector<1x128xf32>
    %c2 = arith.constant 2 : index
    %c0_4 = arith.constant 0 : index
    %3 = vector.load %arg4[%c2, %c0_4] : memref<4x128xf32, #tpu.memory_space<vmem>>, vector<1x128xf32>
    %c3 = arith.constant 3 : index
    %c0_5 = arith.constant 0 : index
    %4 = vector.load %arg4[%c3, %c0_5] : memref<4x128xf32, #tpu.memory_space<vmem>>, vector<1x128xf32>
    %c0_6 = arith.constant 0 : index
    %c0_7 = arith.constant 0 : index
    %5 = vector.load %arg2[%c0_6, %c0_7] : memref<128x8xf32, #tpu.memory_space<vmem>>, vector<128x8xf32>
    %cst = arith.constant dense<0.000000e+00> : vector<16x8xf32>
    %6 = tpu.matmul %0, %5, %cst {dimension_numbers = #tpu.dot_dimension_numbers<[1], [0], [0], [1], [0, 0, 1, 1], [], []>} : vector<16x128xf32>, vector<128x8xf32>, vector<16x8xf32> -> vector<16x8xf32>
    %7 = vector.broadcast %1 : vector<1x8xf32> to vector<16x8xf32>
    %8 = arith.addf %6, %7 : vector<16x8xf32>
    %cst_8 = arith.constant 5.000000e-01 : f32
    %9 = vector.broadcast %cst_8 : f32 to vector<16x8xf32>
    %10 = arith.mulf %9, %8 : vector<16x8xf32>
    %cst_9 = arith.constant 0.707106769 : f32
    %11 = vector.broadcast %cst_9 : f32 to vector<16x8xf32>
    %12 = arith.mulf %8, %11 : vector<16x8xf32>
    %13 = math.erf %12 : vector<16x8xf32>
    %cst_10 = arith.constant 1.000000e+00 : f32
    %14 = vector.broadcast %cst_10 : f32 to vector<16x8xf32>
    %15 = arith.addf %14, %13 : vector<16x8xf32>
    %16 = arith.mulf %10, %15 : vector<16x8xf32>
    %c0_11 = arith.constant 0 : index
    %c0_12 = arith.constant 0 : index
    %17 = vector.load %arg3[%c0_11, %c0_12] : memref<8x128xf32, #tpu.memory_space<vmem>>, vector<8x128xf32>
    %cst_13 = arith.constant dense<0.000000e+00> : vector<16x128xf32>
    %18 = tpu.matmul %16, %17, %cst_13 {dimension_numbers = #tpu.dot_dimension_numbers<[1], [0], [0], [1], [0, 0, 1, 1], [], []>} : vector<16x8xf32>, vector<8x128xf32>, vector<16x128xf32> -> vector<16x128xf32>
    %19 = vector.broadcast %2 : vector<1x128xf32> to vector<16x128xf32>
    %20 = arith.addf %18, %19 : vector<16x128xf32>
    %21 = arith.addf %20, %0 : vector<16x128xf32>
    %cst_14 = arith.constant dense<0.000000e+00> : vector<16xf32>
    %22 = vector.multi_reduction <add>, %21, %cst_14 [1] : vector<16x128xf32> to vector<16xf32>
    %23 = vector.shape_cast %22 : vector<16xf32> to vector<16x1xf32>
    %cst_15 = arith.constant 3.125000e-02 : f32
    %24 = vector.broadcast %cst_15 : f32 to vector<16x1xf32>
    %25 = arith.mulf %23, %24 : vector<16x1xf32>
    %26 = vector.broadcast %25 : vector<16x1xf32> to vector<16x128xf32>
    %27 = arith.subf %21, %26 : vector<16x128xf32>
    %28 = arith.mulf %27, %27 : vector<16x128xf32>
    %cst_16 = arith.constant dense<0.000000e+00> : vector<16xf32>
    %29 = vector.multi_reduction <add>, %28, %cst_16 [1] : vector<16x128xf32> to vector<16xf32>
    %30 = vector.shape_cast %29 : vector<16xf32> to vector<16x1xf32>
    %31 = arith.mulf %25, %25 : vector<16x1xf32>
    %cst_17 = arith.constant 9.600000e+01 : f32
    %32 = vector.broadcast %cst_17 : f32 to vector<16x1xf32>
    %33 = arith.mulf %32, %31 : vector<16x1xf32>
    %34 = arith.subf %30, %33 : vector<16x1xf32>
    %cst_18 = arith.constant 3.125000e-02 : f32
    %35 = vector.broadcast %cst_18 : f32 to vector<16x1xf32>
    %36 = arith.mulf %34, %35 : vector<16x1xf32>
    %cst_19 = arith.constant 9.99999974E-6 : f32
    %37 = vector.broadcast %cst_19 : f32 to vector<16x1xf32>
    %38 = arith.addf %36, %37 : vector<16x1xf32>
    %39 = math.rsqrt %38 : vector<16x1xf32>
    %40 = vector.broadcast %39 : vector<16x1xf32> to vector<16x128xf32>
    %41 = arith.mulf %27, %40 : vector<16x128xf32>
    %42 = vector.broadcast %3 : vector<1x128xf32> to vector<16x128xf32>
    %43 = arith.mulf %41, %42 : vector<16x128xf32>
    %44 = vector.broadcast %4 : vector<1x128xf32> to vector<16x128xf32>
    %45 = arith.addf %43, %44 : vector<16x128xf32>
    %c0_20 = arith.constant 0 : index
    %c0_21 = arith.constant 0 : index
    %46 = vector.load %arg5[%c0_20, %c0_21] : memref<16x128xf32, #tpu.memory_space<vmem>>, vector<16x128xf32>
    tpu.vector_store %arg5[%c0_20, %c0_21], %45 {strides = array<i32>} : memref<16x128xf32, #tpu.memory_space<vmem>>, vector<16x128xf32>,
    return
  }
  func.func @transform_0(%arg0: i32) -> (i32, i32) {
    %c0_i32 = arith.constant 0 : i32
    %c0_i32_0 = arith.constant 0 : i32
    return %arg0, %c0_i32 : i32, i32
  }
  func.func @transform_1(%arg0: i32) -> (i32, i32) {
    %c0_i32 = arith.constant 0 : i32
    %c0_i32_0 = arith.constant 0 : i32
    %c0_i32_1 = arith.constant 0 : i32
    return %c0_i32, %c0_i32_0 : i32, i32
  }
  func.func @transform_2(%arg0: i32) -> (i32, i32) {
    %c0_i32 = arith.constant 0 : i32
    %c0_i32_0 = arith.constant 0 : i32
    %c0_i32_1 = arith.constant 0 : i32
    return %c0_i32, %c0_i32_0 : i32, i32
  }
  func.func @transform_3(%arg0: i32) -> (i32, i32) {
    %c0_i32 = arith.constant 0 : i32
    %c0_i32_0 = arith.constant 0 : i32
    %c0_i32_1 = arith.constant 0 : i32
    return %c0_i32, %c0_i32_0 : i32, i32
  }
  func.func @transform_4(%arg0: i32) -> (i32, i32) {
    %c0_i32 = arith.constant 0 : i32
    %c0_i32_0 = arith.constant 0 : i32
    return %arg0, %c0_i32 : i32, i32
  }
}

module attributes {stable_mosaic.version = 11 : i64} {
  func.func @_adapter_kernel(%arg0: i32, %arg1: memref<16x128xf32, #tpu.memory_space<vmem>>, %arg2: memref<128x8xf32, #tpu.memory_space<vmem>>, %arg3: memref<8x128xf32, #tpu.memory_space<vmem>>, %arg4: memref<4x128xf32, #tpu.memory_space<vmem>>, %arg5: memref<16x128xf32, #tpu.memory_space<vmem>>) attributes {dimension_semantics = [#tpu.dimension_semantics<parallel>], iteration_bounds = array<i64: 1>, scalar_prefetch = 0 : i64, scratch_operands = 0 : i64, tpu.core_type = #tpu.core_type<tc>, window_params = [{transform_indices = @transform_0, window_bounds = array<i64: 16, 128>}, {pipeline_mode = #tpu.pipeline_mode<synchronous>, transform_indices = @transform_1, window_bounds = array<i64: 128, 8>}, {pipeline_mode = #tpu.pipeline_mode<synchronous>, transform_indices = @transform_2, window_bounds = array<i64: 8, 128>}, {pipeline_mode = #tpu.pipeline_mode<synchronous>, transform_indices = @transform_3, window_bounds = array<i64: 4, 128>}, {transform_indices = @transform_4, window_bounds = array<i64: 16, 128>}]} {
    %c0 = arith.constant 0 : index
    %c0_0 = arith.constant 0 : index
    %0 = vector.load %arg1[%c0, %c0_0] : memref<16x128xf32, #tpu.memory_space<vmem>>, vector<16x128xf32>
    %c0_1 = arith.constant 0 : index
    %c0_2 = arith.constant 0 : index
    %1 = vector.load %arg4[%c0_1, %c0_2] : memref<4x128xf32, #tpu.memory_space<vmem>>, vector<1x8xf32>
    %c1 = arith.constant 1 : index
    %c0_3 = arith.constant 0 : index
    %2 = vector.load %arg4[%c1, %c0_3] : memref<4x128xf32, #tpu.memory_space<vmem>>, vector<1x128xf32>
    %c2 = arith.constant 2 : index
    %c0_4 = arith.constant 0 : index
    %3 = vector.load %arg4[%c2, %c0_4] : memref<4x128xf32, #tpu.memory_space<vmem>>, vector<1x128xf32>
    %c3 = arith.constant 3 : index
    %c0_5 = arith.constant 0 : index
    %4 = vector.load %arg4[%c3, %c0_5] : memref<4x128xf32, #tpu.memory_space<vmem>>, vector<1x128xf32>
    %c0_6 = arith.constant 0 : index
    %c0_7 = arith.constant 0 : index
    %5 = vector.load %arg2[%c0_6, %c0_7] : memref<128x8xf32, #tpu.memory_space<vmem>>, vector<128x8xf32>
    %cst = arith.constant dense<0.000000e+00> : vector<16x8xf32>
    %6 = tpu.matmul %0, %5, %cst {dimension_numbers = #tpu.dot_dimension_numbers<[1], [0], [0], [1], [0, 0, 1, 1], [], []>} : vector<16x128xf32>, vector<128x8xf32>, vector<16x8xf32> -> vector<16x8xf32>
    %7 = vector.broadcast %1 : vector<1x8xf32> to vector<16x8xf32>
    %8 = arith.addf %6, %7 : vector<16x8xf32>
    %cst_8 = arith.constant 5.000000e-01 : f32
    %9 = vector.broadcast %cst_8 : f32 to vector<16x8xf32>
    %10 = arith.mulf %9, %8 : vector<16x8xf32>
    %cst_9 = arith.constant 0.707106769 : f32
    %11 = vector.broadcast %cst_9 : f32 to vector<16x8xf32>
    %12 = arith.mulf %8, %11 : vector<16x8xf32>
    %13 = math.erf %12 : vector<16x8xf32>
    %cst_10 = arith.constant 1.000000e+00 : f32
    %14 = vector.broadcast %cst_10 : f32 to vector<16x8xf32>
    %15 = arith.addf %14, %13 : vector<16x8xf32>
    %16 = arith.mulf %10, %15 : vector<16x8xf32>
    %c0_11 = arith.constant 0 : index
    %c0_12 = arith.constant 0 : index
    %17 = vector.load %arg3[%c0_11, %c0_12] : memref<8x128xf32, #tpu.memory_space<vmem>>, vector<8x128xf32>
    %cst_13 = arith.constant dense<0.000000e+00> : vector<16x128xf32>
    %18 = tpu.matmul %16, %17, %cst_13 {dimension_numbers = #tpu.dot_dimension_numbers<[1], [0], [0], [1], [0, 0, 1, 1], [], []>} : vector<16x8xf32>, vector<8x128xf32>, vector<16x128xf32> -> vector<16x128xf32>
    %19 = vector.broadcast %2 : vector<1x128xf32> to vector<16x128xf32>
    %20 = arith.addf %18, %19 : vector<16x128xf32>
    %21 = arith.addf %20, %0 : vector<16x128xf32>
    %cst_14 = arith.constant dense<0.000000e+00> : vector<16xf32>
    %22 = vector.multi_reduction <add>, %21, %cst_14 [1] : vector<16x128xf32> to vector<16xf32>
    %23 = vector.shape_cast %22 : vector<16xf32> to vector<16x1xf32>
    %cst_15 = arith.constant 3.125000e-02 : f32
    %24 = vector.broadcast %cst_15 : f32 to vector<16x1xf32>
    %25 = arith.mulf %23, %24 : vector<16x1xf32>
    %26 = vector.broadcast %25 : vector<16x1xf32> to vector<16x128xf32>
    %27 = arith.subf %21, %26 : vector<16x128xf32>
    %28 = arith.mulf %27, %27 : vector<16x128xf32>
    %cst_16 = arith.constant dense<0.000000e+00> : vector<16xf32>
    %29 = vector.multi_reduction <add>, %28, %cst_16 [1] : vector<16x128xf32> to vector<16xf32>
    %30 = vector.shape_cast %29 : vector<16xf32> to vector<16x1xf32>
    %31 = arith.mulf %25, %25 : vector<16x1xf32>
    %cst_17 = arith.constant 9.600000e+01 : f32
    %32 = vector.broadcast %cst_17 : f32 to vector<16x1xf32>
    %33 = arith.mulf %32, %31 : vector<16x1xf32>
    %34 = arith.subf %30, %33 : vector<16x1xf32>
    %cst_18 = arith.constant 3.125000e-02 : f32
    %35 = vector.broadcast %cst_18 : f32 to vector<16x1xf32>
    %36 = arith.mulf %34, %35 : vector<16x1xf32>
    %cst_19 = arith.constant 9.99999974E-6 : f32
    %37 = vector.broadcast %cst_19 : f32 to vector<16x1xf32>
    %38 = arith.addf %36, %37 : vector<16x1xf32>
    %39 = math.rsqrt %38 : vector<16x1xf32>
    %40 = vector.broadcast %39 : vector<16x1xf32> to vector<16x128xf32>
    %41 = arith.mulf %27, %40 : vector<16x128xf32>
    %42 = vector.broadcast %3 : vector<1x128xf32> to vector<16x128xf32>
    %43 = arith.mulf %41, %42 : vector<16x128xf32>
    %44 = vector.broadcast %4 : vector<1x128xf32> to vector<16x128xf32>
    %45 = arith.addf %43, %44 : vector<16x128xf32>
    %c0_20 = arith.constant 0 : index
    %c0_21 = arith.constant 0 : index
    %46 = vector.load %arg5[%c0_20, %c0_21] : memref<16x128xf32, #tpu.memory_space<vmem>>, vector<16x128xf32>
    tpu.vector_store %arg5[%c0_20, %c0_21], %45 {strides = array<i32>} : memref<16x128xf32, #tpu.memory_space<vmem>>, vector<16x128xf32>,
    return
  }
  func.func @transform_0(%arg0: i32) -> (i32, i32) {
    %c0_i32 = arith.constant 0 : i32
    %c0_i32_0 = arith.constant 0 : i32
    return %arg0, %c0_i32 : i32, i32
  }
  func.func @transform_1(%arg0: i32) -> (i32, i32) {
    %c0_i32 = arith.constant 0 : i32
    %c0_i32_0 = arith.constant 0 : i32
    %c0_i32_1 = arith.constant 0 : i32
    return %c0_i32, %c0_i32_0 : i32, i32
  }
  func.func @transform_2(%arg0: i32) -> (i32, i32) {
    %c0_i32 = arith.constant 0 : i32
    %c0_i32_0 = arith.constant 0 : i32
    %c0_i32_1 = arith.constant 0 : i32
    return %c0_i32, %c0_i32_0 : i32, i32
  }
  func.func @transform_3(%arg0: i32) -> (i32, i32) {
    %c0_i32 = arith.constant 0 : i32
    %c0_i32_0 = arith.constant 0 : i32
    %c0_i32_1 = arith.constant 0 : i32
    return %c0_i32, %c0_i32_0 : i32, i32
  }
  func.func @transform_4(%arg0: i32) -> (i32, i32) {
    %c0_i32 = arith.constant 0 : i32
    %c0_i32_0 = arith.constant 0 : i32
    return %arg0, %c0_i32 : i32, i32
  }
}

</mosaic_0001>

<bundles_post_ra>
// kernel: tpu_custom_call.1
= control target key start
LH: loop header
LB: loop body
LE: loop exit
PB: predicated region body
PF: predicated region fallthrough
CT: control target
= control target key end

     0   :  { %9 = vsyncpa [#allocation3], 0  ;;  %s670_s0 = inlined_call_operand.hbm [shape: f32[16,128], index: 0, kind: input, shape index: {}]   ;;  %s671_s1 = inlined_call_operand.hbm [shape: f32[128,8], index: 1, kind: input, shape index: {}]   ;;  %s672_s2 = inlined_call_operand.hbm [shape: f32[8,128], index: 2, kind: input, shape index: {}]   ;;  %s673_s3 = inlined_call_operand.hbm [shape: f32[4,128], index: 3, kind: input, shape index: {}]   ;;  %s674_s4 = inlined_call_operand.hbm [shape: f32[16,128], index: 4, kind: output, shape index: {}]  }
   0x1   :  { %10 = vsyncpa [#allocation6], 0 }
   0x2   :  { %11 = vsyncpa [#allocation9], 0 }
   0x3   :  { %12 = vsyncpa [#allocation4], 0  ;;  %s562_s15 = smov [#allocation5]   ;;  %s563_s17 = smov [#allocation2]  }
   0x4   :  { %s30_s16 = sshll.u32 %s562_s15, 4  ;;  %s18_s18 = sshll.u32 %s563_s17, 4  ;;  %s31_s16 = int_to_ptr.vmem [resolvable:$true] %s30_s16  ;;  %s594_s18 = int_to_ptr.vmem [resolvable:$true] %s18_s18 }
   0x5   :  { %s444_s21 = scalar_lea.hbm %s671_s1, 2048 }
   0x6   :  { %p445_p0 = scmp.ne.s32.totalorder %s671_s1, %s444_s21  ;;  %p448_p1 = scmp.lt.u32.totalorder %s444_s21, %s671_s1 }
   0x8   :  { %p450_p2 = pnand %p448_p1, %p445_p0 }
   0xa   :  { %453 = shalt.err (!%p450_p2)
}
   0xb   :  { %s454_s26 = scalar_lea.vmem %s31_s16, 2048  ;;  %p459_p4 = scmp.lt.s32.totalorder %s31_s16, %s31_s16 }
   0xc   :  { %p455_p3 = scmp.ne.s32.totalorder %s31_s16, %s454_s26  ;;  %p460_p5 = scmp.lt.s32.totalorder %s454_s26, %s454_s26 }
   0xe   :  { %p461_p6 = por %p460_p5, %p459_p4 }
  0x10   :  { %p462_p7 = pnand %p461_p6, %p455_p3 }
  0x12   :  { %465 = shalt.err (!%p462_p7)
}
  0x13   :  { %s564_s27 = smov 128   ;;  %s565_s28 = smov 8  }
  0x14   :  { %36 = dma.hbm_to_vmem [thread:$0]  %s671_s1, 2048, %s31_s16, [#allocation6], %s564_s27, %s564_s27, %s565_s28  }
  0x15   :  { %s466_s7 = scalar_lea.hbm %s670_s0, 256 }
  0x16   :  { %p467_p8 = scmp.ne.s32.totalorder %s670_s0, %s466_s7  ;;  %p470_p9 = scmp.lt.u32.totalorder %s466_s7, %s670_s0 }
  0x18   :  { %p472_p10 = pnand %p470_p9, %p467_p8 }
  0x1a   :  { %475 = shalt.err (!%p472_p10)
}
  0x1b   :  { %s476_s12 = scalar_lea.vmem %s594_s18, 256  ;;  %p481_p12 = scmp.lt.s32.totalorder %s594_s18, %s594_s18 }
  0x1c   :  { %p477_p11 = scmp.ne.s32.totalorder %s594_s18, %s476_s12  ;;  %p482_p13 = scmp.lt.s32.totalorder %s476_s12, %s476_s12 }
  0x1e   :  { %p483_p0 = por %p482_p13, %p481_p12 }
  0x20   :  { %p484_p1 = pnand %p483_p0, %p477_p11 }
  0x22   :  { %487 = shalt.err (!%p484_p1)
}
  0x23   :  { %24 = dma.hbm_to_vmem [thread:$0]  %s670_s0, 256, %s594_s18, [#allocation3], %s564_s27, %s564_s27, %s565_s28  }
  0x24   :  { %s566_s14 = smov [#allocation7]   ;;  %s567_s16 = smov [#allocation8]  }
  0x25   :  { %s43_s15 = sshll.u32 %s566_s14, 4  ;;  %s53_s17 = sshll.u32 %s567_s16, 4  ;;  %s44_s15 = int_to_ptr.vmem [resolvable:$true] %s43_s15  ;;  %s54_s17 = int_to_ptr.vmem [resolvable:$true] %s53_s17 }
  0x26   :  { %s488_s21 = scalar_lea.hbm %s672_s2, 128 }
  0x27   :  { %p489_p2 = scmp.ne.s32.totalorder %s672_s2, %s488_s21  ;;  %p492_p3 = scmp.lt.u32.totalorder %s488_s21, %s672_s2 }
  0x29   :  { %p494_p4 = pnand %p492_p3, %p489_p2 }
  0x2b   :  { %497 = shalt.err (!%p494_p4)
}
  0x2c   :  { %s498_s0 = scalar_lea.vmem %s44_s15, 128  ;;  %p503_p6 = scmp.lt.s32.totalorder %s44_s15, %s44_s15 }
  0x2d   :  { %p499_p5 = scmp.ne.s32.totalorder %s44_s15, %s498_s0  ;;  %p504_p7 = scmp.lt.s32.totalorder %s498_s0, %s498_s0 }
  0x2f   :  { %p505_p8 = por %p504_p7, %p503_p6 }
  0x31   :  { %p506_p9 = pnand %p505_p8, %p499_p5 }
  0x33   :  { %509 = shalt.err (!%p506_p9)
}
  0x34   :  { %46 = dma.hbm_to_vmem [thread:$0]  %s672_s2, 128, %s44_s15, [#allocation6]  }
  0x35   :  { %s510_s5 = scalar_lea.hbm %s673_s3, 64 }
  0x36   :  { %p511_p10 = scmp.ne.s32.totalorder %s673_s3, %s510_s5  ;;  %p514_p11 = scmp.lt.u32.totalorder %s510_s5, %s673_s3 }
  0x38   :  { %p516_p12 = pnand %p514_p11, %p511_p10 }
  0x3a   :  { %519 = shalt.err (!%p516_p12)
}
  0x3b   :  { %s520_s10 = scalar_lea.vmem %s54_s17, 64  ;;  %p525_p0 = scmp.lt.s32.totalorder %s54_s17, %s54_s17 }
  0x3c   :  { %p521_p13 = scmp.ne.s32.totalorder %s54_s17, %s520_s10  ;;  %p526_p1 = scmp.lt.s32.totalorder %s520_s10, %s520_s10 }
  0x3e   :  { %p527_p2 = por %p526_p1, %p525_p0 }
  0x40   :  { %p528_p3 = pnand %p527_p2, %p521_p13 }
  0x42   :  { %531 = shalt.err (!%p528_p3)
}
  0x43   :  { %56 = dma.hbm_to_vmem [thread:$0]  %s673_s3, 64, %s54_s17, [#allocation9]  }
  0x44   :  { %554 = dma.done.wait [#allocation3], 256  }
  0x45   :  { %555 = vsyncadd [#allocation3], 4294967040 }
  0x46   :  { %556 = dma.done.wait [#allocation6], 2176  }
  0x47   :  { %557 = vsyncadd [#allocation6], 4294965120 }
  0x48   :  { %558 = dma.done.wait [#allocation9], 64  }
  0x49   :  { %559 = vsyncadd [#allocation9], 4294967232  ;;  %v75_v0 = vld [vmem:[#allocation5] sm:$0xff]  ;;  %v76_v1 = vld [vmem:[#allocation5 + $0x8] sm:$0xff]  ;;  %vm185_vm0 = vcmask 64512   ;;  %s568_s3 = smov [#allocation10]  }
  0x4a   :  { %v77_v2 = vld [vmem:[#allocation5 + $0x10] sm:$0xff]  ;;  %v397_v3 = vpack.c.bf16 %v76_v1, %v75_v0  ;;  %v78_v4 = vld [vmem:[#allocation5 + $0x18] sm:$0xff]  ;;  %v79_v6 = vld [vmem:[#allocation5 + $0x20] sm:$0xff]  ;;  %s316_s12 = sshll.u32 %s568_s3, 4  ;;  %s317_s12 = int_to_ptr.vmem [resolvable:$true] %s316_s12 }
  0x4b   :  { %v401_v5 = vpack.c.bf16 %v78_v4, %v77_v2  ;;  %v80_v7 = vld [vmem:[#allocation5 + $0x28] sm:$0xff]  ;;  %v69_v9 = vld [vmem:[#allocation2] sm:$0xff]  ;;  %v82_v11 = vld [vmem:[#allocation5 + $0x38] sm:$0xff]  ;;  %s532_s1 = scalar_lea.vmem %s317_s12, 256  ;;  %p537_p5 = scmp.lt.s32.totalorder %s317_s12, %s317_s12 }
  0x4c   :  { %398 = vmatprep.subr.bf16.mxu0 %v397_v3  ;;  %v405_v8 = vpack.c.bf16 %v80_v7, %v79_v6  ;;  %v81_v10 = vld [vmem:[#allocation5 + $0x30] sm:$0xff]  ;;  %389 = vmatprep.mubr.f32.mxu0 %v69_v9  ;;  %v83_v13 = vld [vmem:[#allocation5 + $0x40] sm:$0xff]  ;;  %v84_v14 = vld [vmem:[#allocation5 + $0x48] sm:$0xff]  ;;  %p533_p4 = scmp.ne.s32.totalorder %s317_s12, %s532_s1  ;;  %p538_p6 = scmp.lt.s32.totalorder %s532_s1, %s532_s1 }
  0x4d   :  { %400 = vmatpush3.bf16.msra.mxu0 %v397_v3  ;;  %v409_v12 = vpack.c.bf16 %v82_v11, %v81_v10  ;;  %v413_v15 = vpack.c.bf16 %v84_v14, %v83_v13  ;;  %v85_v16 = vld [vmem:[#allocation5 + $0x50] sm:$0xff]  ;;  %v86_v17 = vld [vmem:[#allocation5 + $0x58] sm:$0xff]  ;;  %v87_v19 = vld [vmem:[#allocation5 + $0x60] sm:$0xff] }
  0x4e   :  { %402 = vmatprep.subr.bf16.mxu0 %v401_v5  ;;  %v417_v18 = vpack.c.bf16 %v86_v17, %v85_v16  ;;  %v88_v20 = vld [vmem:[#allocation5 + $0x68] sm:$0xff]  ;;  %v89_v22 = vld [vmem:[#allocation5 + $0x70] sm:$0xff]  ;;  %v90_v23 = vld [vmem:[#allocation5 + $0x78] sm:$0xff]  ;;  %p539_p7 = por %p538_p6, %p537_p5 }
  0x4f   :  { %v421_v21 = vpack.c.bf16 %v88_v20, %v87_v19  ;;  %v425_v24 = vpack.c.bf16 %v90_v23, %v89_v22  ;;  %v70_v25 = vld [vmem:[#allocation2 + $0x8] sm:$0xff]  ;;  %v180_v26 = vld [vmem:[#allocation7] sm:$0xff]  ;;  %v330_v27 = vld [vmem:[#allocation8] ss:$0 sm:$0xff] }
  0x50   :  { %392 = vmatprep.subr.mxu1 %v180_v26  ;;  %v331_v42 = vld [vmem:[#allocation8 + $0x1] ss:$0 sm:$0xff]  ;;  %v334_v6 = vld [vmem:[#allocation8 + $0x2] ss:$0 sm:$0xff]  ;;  %p540_p8 = pnand %p539_p7, %p533_p4 }
  0x51   :  { %404 = vmatpush3.bf16.msra.mxu0 %v401_v5  ;;  %393 = vmatpush3.msra.mxu1 %v180_v26 }
  0x52   :  { %406 = vmatprep.subr.bf16.mxu0 %v405_v8 }
  0x55   :  { %408 = vmatpush3.bf16.msra.mxu0 %v405_v8  ;;  %v335_v8 = vld [vmem:[#allocation8 + $0x3] ss:$0 sm:$0xff] }
  0x56   :  { %410 = vmatprep.subr.bf16.mxu0 %v409_v12 }
  0x59   :  { %412 = vmatpush3.bf16.msra.mxu0 %v409_v12 }
  0x5a   :  { %414 = vmatprep.subr.bf16.mxu0 %v413_v15 }
  0x5d   :  { %416 = vmatpush3.bf16.msra.mxu0 %v413_v15 }
  0x5e   :  { %418 = vmatprep.subr.bf16.mxu0 %v417_v18 }
  0x61   :  { %420 = vmatpush3.bf16.msra.mxu0 %v417_v18 }
  0x62   :  { %422 = vmatprep.subr.bf16.mxu0 %v421_v21 }
  0x65   :  { %424 = vmatpush3.bf16.msra.mxu0 %v421_v21 }
  0x66   :  { %426 = vmatprep.subr.bf16.mxu0 %v425_v24 }
  0x69   :  { %428 = vmatpush3.bf16.msra.mxu0 %v425_v24 }
  0x6c   :  { %390 = vmatmul.mubr.f32.vlgmr.msra.gmra.mrb[0].mxu0 %v70_v25 }
 0x13f   :  { %v391_v28 = vpop.f32.mrb[0].mxu0 }
 0x140   :  { %v167_v29 = vadd.f32 %v391_v28, %v330_v27  ;;  %v161_v30 = vpop.f32.mrb[1].mxu0 }
 0x141   :  { %v162_v31 = vadd.f32 %v330_v27, %v161_v30 }
 0x142   :  { %v173_v32 = vmul.f32 0.70710677, %v167_v29  ;;  %v171_v39 = vmul.f32 0.5, %v167_v29 }
 0x143   :  { %v172_v33 = vmul.f32 0.70710677, %v162_v31  ;;  %v170_v37 = vmul.f32 0.5, %v162_v31 }
 0x144   :  { %436 = verf.f32 %v173_v32 }
 0x145   :  { %438 = verf.f32 %v172_v33 }
 0x14e   :  { %v437_v34 = vpop.eup %436 }
 0x14f   :  { %v439_v35 = vpop.eup %438  ;;  %v177_v36 = vadd.f32 1.0, %v437_v34 }
 0x150   :  { %v176_v38 = vadd.f32 1.0, %v439_v35 }
 0x151   :  { %v179_v41 = vmul.f32 %v177_v36, %v171_v39 }
 0x152   :  { %v178_v40 = vmul.f32 %v176_v38, %v170_v37 }
 0x154   :  { %394 = vmatprep.mubr.msk.f32.mxu1 %vm185_vm0, %v178_v40 }
 0x155   :  { %395 = vmatmul.mubr.msk.f32.vlgmr.msra.gmra.mrb[0].mxu1 %vm185_vm0, %v179_v41 }
 0x228   :  { %v396_v43 = vpop.f32.mrb[0].mxu1 }
 0x229   :  { %v258_v44 = vpop.f32.mrb[1].mxu1  ;;  %v264_v46 = vadd.f32 %v396_v43, %v331_v42 }
 0x22a   :  { %v259_v45 = vadd.f32 %v331_v42, %v258_v44 }
 0x22b   :  { %v268_v48 = vadd.f32 %v264_v46, %v70_v25 }
 0x22c   :  { %v267_v47 = vadd.f32 %v259_v45, %v69_v9 }
 0x22e   :  { %269 = vadd.xlane.f32.xlu0 %v267_v47 }
 0x232   :  { %271 = vadd.xlane.f32.xlu0 %v268_v48 }
 0x2bb   :  { %v270_v49 = vpop.xlane.xlu0 %269 }
 0x2bc   :  { %v273_v50 = vmul.f32 0.03125, %v270_v49 }
 0x2be   :  { %v275_v51 = vsub.f32 %v267_v47, %v273_v50  ;;  %v283_v57 = vmul.f32 %v273_v50, %v273_v50 }
 0x2bf   :  { %v272_v52 = vpop.xlane.xlu0 %271 }
 0x2c0   :  { %v274_v53 = vmul.f32 0.03125, %v272_v52  ;;  %v277_v54 = vmul.f32 %v275_v51, %v275_v51  ;;  %v285_v59 = vmul.f32 96.0, %v283_v57 }
 0x2c2   :  { %v276_v55 = vsub.f32 %v268_v48, %v274_v53  ;;  %279 = vadd.xlane.f32.xlu1 %v277_v54  ;;  %v284_v58 = vmul.f32 %v274_v53, %v274_v53 }
 0x2c4   :  { %v278_v56 = vmul.f32 %v276_v55, %v276_v55  ;;  %v286_v62 = vmul.f32 96.0, %v284_v58 }
 0x2c6   :  { %281 = vadd.xlane.f32.xlu1 %v278_v56 }
 0x34f   :  { %v280_v60 = vpop.xlane.xlu1 %279 }
 0x350   :  { %v287_v61 = vsub.f32 %v280_v60, %v285_v59 }
 0x352   :  { %v289_v63 = vmul.f32 0.03125, %v287_v61 }
 0x353   :  { %v282_v0 = vpop.xlane.xlu1 %281 }
 0x354   :  { %v291_v1 = vadd.f32 1e-05, %v289_v63  ;;  %v288_v2 = vsub.f32 %v282_v0, %v286_v62 }
 0x356   :  { %440 = vrsqrt.f32 %v291_v1  ;;  %v290_v3 = vmul.f32 0.03125, %v288_v2 }
 0x358   :  { %v292_v4 = vadd.f32 1e-05, %v290_v3 }
 0x35a   :  { %442 = vrsqrt.f32 %v292_v4 }
 0x360   :  { %v441_v5 = vpop.eup %440 }
 0x361   :  { %v295_v7 = vmul.f32 %v441_v5, %v275_v51 }
 0x363   :  { %v301_v9 = vmul.f32 %v334_v6, %v295_v7 }
 0x364   :  { %v443_v10 = vpop.eup %442 }
 0x365   :  { %v296_v11 = vmul.f32 %v443_v10, %v276_v55  ;;  %v307_v12 = vadd.f32 %v335_v8, %v301_v9 }
 0x367   :  { %v302_v13 = vmul.f32 %v334_v6, %v296_v11  ;;  %309 = vst [vmem:[#allocation10] sm:$0xff] %v307_v12 }
 0x369   :  { %v308_v14 = vadd.f32 %v335_v8, %v302_v13 }
 0x36b   :  { %310 = vst [vmem:[#allocation10 + $0x8] sm:$0xff] %v308_v14 }
 0x36c   :  { %543 = shalt.err (!%p540_p8)
}
 0x36d   :  { %s544_s15 = scalar_lea.hbm %s674_s4, 256 }
 0x36e   :  { %p545_p9 = scmp.ne.s32.totalorder %s674_s4, %s544_s15  ;;  %p548_p10 = scmp.lt.u32.totalorder %s544_s15, %s674_s4 }
 0x370   :  { %p550_p11 = pnand %p548_p10, %p545_p9 }
 0x372   :  { %553 = shalt.err (!%p550_p11)
}
 0x373   :  { %322 = dma.vmem_to_hbm [thread:$0]  %s317_s12, 256, %s674_s4, [#allocation4], %s564_s27, %s564_s27, %s565_s28  }
 0x374   :  { %560 = dma.done.wait [#allocation4], 256  }
 0x375   :  { %561 = vsyncadd [#allocation4], 4294967040 }
 0x376   :  { %326 = vsyncpa [#allocation3], 1 }
 0x377   :  { %327 = vsyncpa [#allocation6], 1 }
 0x378   :  { %328 = vsyncpa [#allocation9], 1 }
 0x379   :  { %329 = vsyncpa [#allocation4], 1 }

// kernel: tpu_custom_call.1
= control target key start
LH: loop header
LB: loop body
LE: loop exit
PB: predicated region body
PF: predicated region fallthrough
CT: control target
= control target key end

     0   :  { %9 = vsyncpa [#allocation3], 0  ;;  %s670_s0 = inlined_call_operand.hbm [shape: f32[16,128], index: 0, kind: input, shape index: {}]   ;;  %s671_s1 = inlined_call_operand.hbm [shape: f32[128,8], index: 1, kind: input, shape index: {}]   ;;  %s672_s2 = inlined_call_operand.hbm [shape: f32[8,128], index: 2, kind: input, shape index: {}]   ;;  %s673_s3 = inlined_call_operand.hbm [shape: f32[4,128], index: 3, kind: input, shape index: {}]   ;;  %s674_s4 = inlined_call_operand.hbm [shape: f32[16,128], index: 4, kind: output, shape index: {}]  }
   0x1   :  { %10 = vsyncpa [#allocation6], 0 }
   0x2   :  { %11 = vsyncpa [#allocation9], 0 }
   0x3   :  { %12 = vsyncpa [#allocation4], 0  ;;  %s562_s15 = smov [#allocation5]   ;;  %s563_s17 = smov [#allocation2]  }
   0x4   :  { %s30_s16 = sshll.u32 %s562_s15, 4  ;;  %s18_s18 = sshll.u32 %s563_s17, 4  ;;  %s31_s16 = int_to_ptr.vmem [resolvable:$true] %s30_s16  ;;  %s594_s18 = int_to_ptr.vmem [resolvable:$true] %s18_s18 }
   0x5   :  { %s444_s21 = scalar_lea.hbm %s671_s1, 2048 }
   0x6   :  { %p445_p0 = scmp.ne.s32.totalorder %s671_s1, %s444_s21  ;;  %p448_p1 = scmp.lt.u32.totalorder %s444_s21, %s671_s1 }
   0x8   :  { %p450_p2 = pnand %p448_p1, %p445_p0 }
   0xa   :  { %453 = shalt.err (!%p450_p2)
}
   0xb   :  { %s454_s26 = scalar_lea.vmem %s31_s16, 2048  ;;  %p459_p4 = scmp.lt.s32.totalorder %s31_s16, %s31_s16 }
   0xc   :  { %p455_p3 = scmp.ne.s32.totalorder %s31_s16, %s454_s26  ;;  %p460_p5 = scmp.lt.s32.totalorder %s454_s26, %s454_s26 }
   0xe   :  { %p461_p6 = por %p460_p5, %p459_p4 }
  0x10   :  { %p462_p7 = pnand %p461_p6, %p455_p3 }
  0x12   :  { %465 = shalt.err (!%p462_p7)
}
  0x13   :  { %s564_s27 = smov 128   ;;  %s565_s28 = smov 8  }
  0x14   :  { %36 = dma.hbm_to_vmem [thread:$0]  %s671_s1, 2048, %s31_s16, [#allocation6], %s564_s27, %s564_s27, %s565_s28  }
  0x15   :  { %s466_s7 = scalar_lea.hbm %s670_s0, 256 }
  0x16   :  { %p467_p8 = scmp.ne.s32.totalorder %s670_s0, %s466_s7  ;;  %p470_p9 = scmp.lt.u32.totalorder %s466_s7, %s670_s0 }
  0x18   :  { %p472_p10 = pnand %p470_p9, %p467_p8 }
  0x1a   :  { %475 = shalt.err (!%p472_p10)
}
  0x1b   :  { %s476_s12 = scalar_lea.vmem %s594_s18, 256  ;;  %p481_p12 = scmp.lt.s32.totalorder %s594_s18, %s594_s18 }
  0x1c   :  { %p477_p11 = scmp.ne.s32.totalorder %s594_s18, %s476_s12  ;;  %p482_p13 = scmp.lt.s32.totalorder %s476_s12, %s476_s12 }
  0x1e   :  { %p483_p0 = por %p482_p13, %p481_p12 }
  0x20   :  { %p484_p1 = pnand %p483_p0, %p477_p11 }
  0x22   :  { %487 = shalt.err (!%p484_p1)
}
  0x23   :  { %24 = dma.hbm_to_vmem [thread:$0]  %s670_s0, 256, %s594_s18, [#allocation3], %s564_s27, %s564_s27, %s565_s28  }
  0x24   :  { %s566_s14 = smov [#allocation7]   ;;  %s567_s16 = smov [#allocation8]  }
  0x25   :  { %s43_s15 = sshll.u32 %s566_s14, 4  ;;  %s53_s17 = sshll.u32 %s567_s16, 4  ;;  %s44_s15 = int_to_ptr.vmem [resolvable:$true] %s43_s15  ;;  %s54_s17 = int_to_ptr.vmem [resolvable:$true] %s53_s17 }
  0x26   :  { %s488_s21 = scalar_lea.hbm %s672_s2, 128 }
  0x27   :  { %p489_p2 = scmp.ne.s32.totalorder %s672_s2, %s488_s21  ;;  %p492_p3 = scmp.lt.u32.totalorder %s488_s21, %s672_s2 }
  0x29   :  { %p494_p4 = pnand %p492_p3, %p489_p2 }
  0x2b   :  { %497 = shalt.err (!%p494_p4)
}
  0x2c   :  { %s498_s0 = scalar_lea.vmem %s44_s15, 128  ;;  %p503_p6 = scmp.lt.s32.totalorder %s44_s15, %s44_s15 }
  0x2d   :  { %p499_p5 = scmp.ne.s32.totalorder %s44_s15, %s498_s0  ;;  %p504_p7 = scmp.lt.s32.totalorder %s498_s0, %s498_s0 }
  0x2f   :  { %p505_p8 = por %p504_p7, %p503_p6 }
  0x31   :  { %p506_p9 = pnand %p505_p8, %p499_p5 }
  0x33   :  { %509 = shalt.err (!%p506_p9)
}
  0x34   :  { %46 = dma.hbm_to_vmem [thread:$0]  %s672_s2, 128, %s44_s15, [#allocation6]  }
  0x35   :  { %s510_s5 = scalar_lea.hbm %s673_s3, 64 }
  0x36   :  { %p511_p10 = scmp.ne.s32.totalorder %s673_s3, %s510_s5  ;;  %p514_p11 = scmp.lt.u32.totalorder %s510_s5, %s673_s3 }
  0x38   :  { %p516_p12 = pnand %p514_p11, %p511_p10 }
  0x3a   :  { %519 = shalt.err (!%p516_p12)
}
  0x3b   :  { %s520_s10 = scalar_lea.vmem %s54_s17, 64  ;;  %p525_p0 = scmp.lt.s32.totalorder %s54_s17, %s54_s17 }
  0x3c   :  { %p521_p13 = scmp.ne.s32.totalorder %s54_s17, %s520_s10  ;;  %p526_p1 = scmp.lt.s32.totalorder %s520_s10, %s520_s10 }
  0x3e   :  { %p527_p2 = por %p526_p1, %p525_p0 }
  0x40   :  { %p528_p3 = pnand %p527_p2, %p521_p13 }
  0x42   :  { %531 = shalt.err (!%p528_p3)
}
  0x43   :  { %56 = dma.hbm_to_vmem [thread:$0]  %s673_s3, 64, %s54_s17, [#allocation9]  }
  0x44   :  { %554 = dma.done.wait [#allocation3], 256  }
  0x45   :  { %555 = vsyncadd [#allocation3], 4294967040 }
  0x46   :  { %556 = dma.done.wait [#allocation6], 2176  }
  0x47   :  { %557 = vsyncadd [#allocation6], 4294965120 }
  0x48   :  { %558 = dma.done.wait [#allocation9], 64  }
  0x49   :  { %559 = vsyncadd [#allocation9], 4294967232  ;;  %v75_v0 = vld [vmem:[#allocation5] sm:$0xff]  ;;  %v76_v1 = vld [vmem:[#allocation5 + $0x8] sm:$0xff]  ;;  %vm185_vm0 = vcmask 64512   ;;  %s568_s3 = smov [#allocation10]  }
  0x4a   :  { %v77_v2 = vld [vmem:[#allocation5 + $0x10] sm:$0xff]  ;;  %v397_v3 = vpack.c.bf16 %v76_v1, %v75_v0  ;;  %v78_v4 = vld [vmem:[#allocation5 + $0x18] sm:$0xff]  ;;  %v79_v6 = vld [vmem:[#allocation5 + $0x20] sm:$0xff]  ;;  %s316_s12 = sshll.u32 %s568_s3, 4  ;;  %s317_s12 = int_to_ptr.vmem [resolvable:$true] %s316_s12 }
  0x4b   :  { %v401_v5 = vpack.c.bf16 %v78_v4, %v77_v2  ;;  %v80_v7 = vld [vmem:[#allocation5 + $0x28] sm:$0xff]  ;;  %v69_v9 = vld [vmem:[#allocation2] sm:$0xff]  ;;  %v82_v11 = vld [vmem:[#allocation5 + $0x38] sm:$0xff]  ;;  %s532_s1 = scalar_lea.vmem %s317_s12, 256  ;;  %p537_p5 = scmp.lt.s32.totalorder %s317_s12, %s317_s12 }
  0x4c   :  { %398 = vmatprep.subr.bf16.mxu0 %v397_v3  ;;  %v405_v8 = vpack.c.bf16 %v80_v7, %v79_v6  ;;  %v81_v10 = vld [vmem:[#allocation5 + $0x30] sm:$0xff]  ;;  %389 = vmatprep.mubr.f32.mxu0 %v69_v9  ;;  %v83_v13 = vld [vmem:[#allocation5 + $0x40] sm:$0xff]  ;;  %v84_v14 = vld [vmem:[#allocation5 + $0x48] sm:$0xff]  ;;  %p533_p4 = scmp.ne.s32.totalorder %s317_s12, %s532_s1  ;;  %p538_p6 = scmp.lt.s32.totalorder %s532_s1, %s532_s1 }
  0x4d   :  { %400 = vmatpush3.bf16.msra.mxu0 %v397_v3  ;;  %v409_v12 = vpack.c.bf16 %v82_v11, %v81_v10  ;;  %v413_v15 = vpack.c.bf16 %v84_v14, %v83_v13  ;;  %v85_v16 = vld [vmem:[#allocation5 + $0x50] sm:$0xff]  ;;  %v86_v17 = vld [vmem:[#allocation5 + $0x58] sm:$0xff]  ;;  %v87_v19 = vld [vmem:[#allocation5 + $0x60] sm:$0xff] }
  0x4e   :  { %402 = vmatprep.subr.bf16.mxu0 %v401_v5  ;;  %v417_v18 = vpack.c.bf16 %v86_v17, %v85_v16  ;;  %v88_v20 = vld [vmem:[#allocation5 + $0x68] sm:$0xff]  ;;  %v89_v22 = vld [vmem:[#allocation5 + $0x70] sm:$0xff]  ;;  %v90_v23 = vld [vmem:[#allocation5 + $0x78] sm:$0xff]  ;;  %p539_p7 = por %p538_p6, %p537_p5 }
  0x4f   :  { %v421_v21 = vpack.c.bf16 %v88_v20, %v87_v19  ;;  %v425_v24 = vpack.c.bf16 %v90_v23, %v89_v22  ;;  %v70_v25 = vld [vmem:[#allocation2 + $0x8] sm:$0xff]  ;;  %v180_v26 = vld [vmem:[#allocation7] sm:$0xff]  ;;  %v330_v27 = vld [vmem:[#allocation8] ss:$0 sm:$0xff] }
  0x50   :  { %392 = vmatprep.subr.mxu1 %v180_v26  ;;  %v331_v42 = vld [vmem:[#allocation8 + $0x1] ss:$0 sm:$0xff]  ;;  %v334_v6 = vld [vmem:[#allocation8 + $0x2] ss:$0 sm:$0xff]  ;;  %p540_p8 = pnand %p539_p7, %p533_p4 }
  0x51   :  { %404 = vmatpush3.bf16.msra.mxu0 %v401_v5  ;;  %393 = vmatpush3.msra.mxu1 %v180_v26 }
  0x52   :  { %406 = vmatprep.subr.bf16.mxu0 %v405_v8 }
  0x55   :  { %408 = vmatpush3.bf16.msra.mxu0 %v405_v8  ;;  %v335_v8 = vld [vmem:[#allocation8 + $0x3] ss:$0 sm:$0xff] }
  0x56   :  { %410 = vmatprep.subr.bf16.mxu0 %v409_v12 }
  0x59   :  { %412 = vmatpush3.bf16.msra.mxu0 %v409_v12 }
  0x5a   :  { %414 = vmatprep.subr.bf16.mxu0 %v413_v15 }
  0x5d   :  { %416 = vmatpush3.bf16.msra.mxu0 %v413_v15 }
  0x5e   :  { %418 = vmatprep.subr.bf16.mxu0 %v417_v18 }
  0x61   :  { %420 = vmatpush3.bf16.msra.mxu0 %v417_v18 }
  0x62   :  { %422 = vmatprep.subr.bf16.mxu0 %v421_v21 }
  0x65   :  { %424 = vmatpush3.bf16.msra.mxu0 %v421_v21 }
  0x66   :  { %426 = vmatprep.subr.bf16.mxu0 %v425_v24 }
  0x69   :  { %428 = vmatpush3.bf16.msra.mxu0 %v425_v24 }
  0x6c   :  { %390 = vmatmul.mubr.f32.vlgmr.msra.gmra.mrb[0].mxu0 %v70_v25 }
 0x13f   :  { %v391_v28 = vpop.f32.mrb[0].mxu0 }
 0x140   :  { %v167_v29 = vadd.f32 %v391_v28, %v330_v27  ;;  %v161_v30 = vpop.f32.mrb[1].mxu0 }
 0x141   :  { %v162_v31 = vadd.f32 %v330_v27, %v161_v30 }
 0x142   :  { %v173_v32 = vmul.f32 0.70710677, %v167_v29  ;;  %v171_v39 = vmul.f32 0.5, %v167_v29 }
 0x143   :  { %v172_v33 = vmul.f32 0.70710677, %v162_v31  ;;  %v170_v37 = vmul.f32 0.5, %v162_v31 }
 0x144   :  { %436 = verf.f32 %v173_v32 }
 0x145   :  { %438 = verf.f32 %v172_v33 }
 0x14e   :  { %v437_v34 = vpop.eup %436 }
 0x14f   :  { %v439_v35 = vpop.eup %438  ;;  %v177_v36 = vadd.f32 1.0, %v437_v34 }
 0x150   :  { %v176_v38 = vadd.f32 1.0, %v439_v35 }
 0x151   :  { %v179_v41 = vmul.f32 %v177_v36, %v171_v39 }
 0x152   :  { %v178_v40 = vmul.f32 %v176_v38, %v170_v37 }
 0x154   :  { %394 = vmatprep.mubr.msk.f32.mxu1 %vm185_vm0, %v178_v40 }
 0x155   :  { %395 = vmatmul.mubr.msk.f32.vlgmr.msra.gmra.mrb[0].mxu1 %vm185_vm0, %v179_v41 }
 0x228   :  { %v396_v43 = vpop.f32.mrb[0].mxu1 }
 0x229   :  { %v258_v44 = vpop.f32.mrb[1].mxu1  ;;  %v264_v46 = vadd.f32 %v396_v43, %v331_v42 }
 0x22a   :  { %v259_v45 = vadd.f32 %v331_v42, %v258_v44 }
 0x22b   :  { %v268_v48 = vadd.f32 %v264_v46, %v70_v25 }
 0x22c   :  { %v267_v47 = vadd.f32 %v259_v45, %v69_v9 }
 0x22e   :  { %269 = vadd.xlane.f32.xlu0 %v267_v47 }
 0x232   :  { %271 = vadd.xlane.f32.xlu0 %v268_v48 }
 0x2bb   :  { %v270_v49 = vpop.xlane.xlu0 %269 }
 0x2bc   :  { %v273_v50 = vmul.f32 0.03125, %v270_v49 }
 0x2be   :  { %v275_v51 = vsub.f32 %v267_v47, %v273_v50  ;;  %v283_v57 = vmul.f32 %v273_v50, %v273_v50 }
 0x2bf   :  { %v272_v52 = vpop.xlane.xlu0 %271 }
 0x2c0   :  { %v274_v53 = vmul.f32 0.03125, %v272_v52  ;;  %v277_v54 = vmul.f32 %v275_v51, %v275_v51  ;;  %v285_v59 = vmul.f32 96.0, %v283_v57 }
 0x2c2   :  { %v276_v55 = vsub.f32 %v268_v48, %v274_v53  ;;  %279 = vadd.xlane.f32.xlu1 %v277_v54  ;;  %v284_v58 = vmul.f32 %v274_v53, %v274_v53 }
 0x2c4   :  { %v278_v56 = vmul.f32 %v276_v55, %v276_v55  ;;  %v286_v62 = vmul.f32 96.0, %v284_v58 }
 0x2c6   :  { %281 = vadd.xlane.f32.xlu1 %v278_v56 }
 0x34f   :  { %v280_v60 = vpop.xlane.xlu1 %279 }
 0x350   :  { %v287_v61 = vsub.f32 %v280_v60, %v285_v59 }
 0x352   :  { %v289_v63 = vmul.f32 0.03125, %v287_v61 }
 0x353   :  { %v282_v0 = vpop.xlane.xlu1 %281 }
 0x354   :  { %v291_v1 = vadd.f32 1e-05, %v289_v63  ;;  %v288_v2 = vsub.f32 %v282_v0, %v286_v62 }
 0x356   :  { %440 = vrsqrt.f32 %v291_v1  ;;  %v290_v3 = vmul.f32 0.03125, %v288_v2 }
 0x358   :  { %v292_v4 = vadd.f32 1e-05, %v290_v3 }
 0x35a   :  { %442 = vrsqrt.f32 %v292_v4 }
 0x360   :  { %v441_v5 = vpop.eup %440 }
 0x361   :  { %v295_v7 = vmul.f32 %v441_v5, %v275_v51 }
 0x363   :  { %v301_v9 = vmul.f32 %v334_v6, %v295_v7 }
 0x364   :  { %v443_v10 = vpop.eup %442 }
 0x365   :  { %v296_v11 = vmul.f32 %v443_v10, %v276_v55  ;;  %v307_v12 = vadd.f32 %v335_v8, %v301_v9 }
 0x367   :  { %v302_v13 = vmul.f32 %v334_v6, %v296_v11  ;;  %309 = vst [vmem:[#allocation10] sm:$0xff] %v307_v12 }
 0x369   :  { %v308_v14 = vadd.f32 %v335_v8, %v302_v13 }
 0x36b   :  { %310 = vst [vmem:[#allocation10 + $0x8] sm:$0xff] %v308_v14 }
 0x36c   :  { %543 = shalt.err (!%p540_p8)
}
 0x36d   :  { %s544_s15 = scalar_lea.hbm %s674_s4, 256 }
 0x36e   :  { %p545_p9 = scmp.ne.s32.totalorder %s674_s4, %s544_s15  ;;  %p548_p10 = scmp.lt.u32.totalorder %s544_s15, %s674_s4 }
 0x370   :  { %p550_p11 = pnand %p548_p10, %p545_p9 }
 0x372   :  { %553 = shalt.err (!%p550_p11)
}
 0x373   :  { %322 = dma.vmem_to_hbm [thread:$0]  %s317_s12, 256, %s674_s4, [#allocation4], %s564_s27, %s564_s27, %s565_s28  }
 0x374   :  { %560 = dma.done.wait [#allocation4], 256  }
 0x375   :  { %561 = vsyncadd [#allocation4], 4294967040 }
 0x376   :  { %326 = vsyncpa [#allocation3], 1 }
 0x377   :  { %327 = vsyncpa [#allocation6], 1 }
 0x378   :  { %328 = vsyncpa [#allocation9], 1 }
 0x379   :  { %329 = vsyncpa [#allocation4], 1 }

</bundles_post_ra>
